<compile_context>
chip_gen: v7x
topology: tpu7x:2x2x1
jax: 0.10.0
libtpu: 0.0.40
codegen_flags: <defaults>
</compile_context>

<pallas_src>
import functools

import jax
import jax.numpy as jnp
from jax.experimental import pallas as pl
from jax.experimental.pallas import tpu as pltpu

LANES = 128  # lane width of the packed parameter block


def _round_up(n, m):
    return ((n + m - 1) // m) * m


def _param_layout(h1, h2, out_f):
    """Row offsets of each (transposed) weight+bias block inside the packed block."""
    r1 = 0                       # rows [0, h1)        : [W1^T | b1]
    r2 = _round_up(h1, 8)        # rows [r2, r2 + h2)  : [W2^T | b2]
    r3 = r2 + _round_up(h2, 8)   # rows [r3, r3 + out) : [W3^T | b3]
    n_rows = _round_up(r3 + out_f, 8)
    return r1, r2, r3, n_rows


def _pack_params(w1, b1, w2, b2, w3, b3):
    """Pack transposed weights + biases into one zero-padded (n_rows, 128) f32 block.

    Weights come in as (fan_in, fan_out); stored transposed so the kernel reads
    weight *columns* (per input feature) directly:  cols [0, fan_in) = W^T,
    col fan_in = bias.
    """
    in_f, h1 = w1.shape
    _, h2 = w2.shape
    _, out_f = w3.shape
    assert max(in_f, h1, h2, out_f) + 1 <= LANES
    r1, r2, r3, n_rows = _param_layout(h1, h2, out_f)

    p = jnp.zeros((n_rows, LANES), jnp.float32)
    p = p.at[r1:r1 + h1, 0:in_f].set(w1.T.astype(jnp.float32))
    p = p.at[r1:r1 + h1, in_f].set(b1.reshape(-1).astype(jnp.float32))
    p = p.at[r2:r2 + h2, 0:h1].set(w2.T.astype(jnp.float32))
    p = p.at[r2:r2 + h2, h1].set(b2.reshape(-1).astype(jnp.float32))
    p = p.at[r3:r3 + out_f, 0:h2].set(w3.T.astype(jnp.float32))
    p = p.at[r3:r3 + out_f, h2].set(b3.reshape(-1).astype(jnp.float32))
    return p


def mlp_kernel(x_ref, p_ref, o_ref, *, in_f, h1, h2, out_f, r1, r2, r3):
    x = x_ref[...]                                   # (in_f, TM) f32

    # Static sub-slices of the resident packed-parameter block (read once each).
    wb1 = p_ref[r1:r1 + h1, 0:in_f + 1]              # (h1, in_f+1)  [W1^T | b1]
    wb2 = p_ref[r2:r2 + h2, 0:h1 + 1]                # (h2, h1+1)    [W2^T | b2]
    wb3 = p_ref[r3:r3 + out_f, 0:h2 + 1]             # (out, h2+1)   [W3^T | b3]

    # Layer 1: Linear(in_f -> h1) + ReLU, unrolled outer-product sum on the VPU.
    h = wb1[:, in_f:in_f + 1]                        # bias column (h1, 1)
    for k in range(in_f):
        h = h + wb1[:, k:k + 1] * x[k:k + 1, :]
    h = jnp.maximum(h, 0.0)                          # (h1, TM)

    # Layer 2: Linear(h1 -> h2) + ReLU.
    g = wb2[:, h1:h1 + 1]                            # (h2, 1)
    for k in range(h1):
        g = g + wb2[:, k:k + 1] * h[k:k + 1, :]
    g = jnp.maximum(g, 0.0)                          # (h2, TM)

    # Output layer: Linear(h2 -> out_f), no activation.
    y = wb3[:, h2:h2 + 1]                            # (out_f, 1)
    for k in range(h2):
        y = y + wb3[:, k:k + 1] * g[k:k + 1, :]

    o_ref[...] = y.astype(o_ref.dtype)               # lane-dense (out_f, TM) store


def mlp_forward(x, params, *, tile_m=4096):
    """x: (B, in_features) float32. params: dict of weights (in,out) / biases (out,)."""
    w1, b1, w2, b2, w3, b3 = (params["w1"], params["b1"], params["w2"],
                              params["b2"], params["w3"], params["b3"])
    B, in_f = x.shape
    h1 = w1.shape[1]
    h2 = w2.shape[1]
    out_f = w3.shape[1]

    r1, r2, r3, n_rows = _param_layout(h1, h2, out_f)
    packed = _pack_params(w1, b1, w2, b2, w3, b3)

    # Feature-major layout: batch on the lane axis.  Tiles must be multiples of
    # 128 lanes; per-tile VMEM is tiny (< 200 KiB even at tile_m=4096), so pick
    # a large tile to amortize the ~0.35 us per-grid-step overhead.
    tile_m = _round_up(tile_m, LANES)
    tm = min(tile_m, _round_up(B, LANES))
    b_pad = _round_up(B, tm)

    xt = jnp.transpose(x.astype(jnp.float32))        # (in_f, B) — layout plumbing
    if b_pad != B:
        xt = jnp.pad(xt, ((0, 0), (0, b_pad - B)))

    kernel = functools.partial(mlp_kernel, in_f=in_f, h1=h1, h2=h2, out_f=out_f,
                               r1=r1, r2=r2, r3=r3)

    out_t = pl.pallas_call(
        kernel,
        out_shape=jax.ShapeDtypeStruct((out_f, b_pad), jnp.float32),
        grid=(b_pad // tm,),
        in_specs=[
            pl.BlockSpec((in_f, tm), lambda i: (0, i)),        # x tiles stream in
            pl.BlockSpec((n_rows, LANES), lambda i: (0, 0)),   # params stay resident
        ],
        out_specs=pl.BlockSpec((out_f, tm), lambda i: (0, i)),
        compiler_params=pltpu.CompilerParams(
            dimension_semantics=("parallel",)),
        cost_estimate=pl.CostEstimate(
            flops=2 * b_pad * (in_f * h1 + h1 * h2 + h2 * out_f),
            transcendentals=0,
            bytes_accessed=4 * (b_pad * (in_f + out_f) + n_rows * LANES)),
    )(xt, packed)

    return jnp.transpose(out_t[:, :B])               # (B, out_f)


def init_params(key, in_features=4, h1=8, h2=6, out_features=3):
    """Deterministic init mimicking nn.Linear's uniform(-1/sqrt(fan_in), ...)."""
    ks = jax.random.split(key, 6)

    def lin(kw, kb, fan_in, fan_out):
        bound = 1.0 / jnp.sqrt(jnp.float32(fan_in))
        # stored as (fan_in, fan_out) so the reference computes x @ W
        w = jax.random.uniform(kw, (fan_in, fan_out), jnp.float32, -bound, bound)
        b = jax.random.uniform(kb, (fan_out,), jnp.float32, -bound, bound)
        return w, b

    w1, b1 = lin(ks[0], ks[1], in_features, h1)
    w2, b2 = lin(ks[2], ks[3], h1, h2)
    w3, b3 = lin(ks[4], ks[5], h2, out_features)
    return {"w1": w1, "b1": b1, "w2": w2, "b2": b2, "w3": w3, "b3": b3}


def mlp_reference(x, p):
    h = jnp.maximum(x @ p["w1"] + p["b1"], 0.0)
    h = jnp.maximum(h @ p["w2"] + p["b2"], 0.0)
    return h @ p["w3"] + p["b3"]


if __name__ == "__main__":
    key = jax.random.PRNGKey(0)
    k_param, k_x = jax.random.split(key)

    in_features, h1, h2, out_features = 4, 8, 6, 3
    batch = 8

    params = init_params(k_param, in_features, h1, h2, out_features)
    x = jax.random.normal(k_x, (batch, in_features), dtype=jnp.float32)

    out = jax.block_until_ready(mlp_forward(x, params))
    ref = mlp_reference(x, params)

    assert out.shape == (batch, out_features)
    assert jnp.allclose(out, ref, atol=1e-5, rtol=1e-5), float(jnp.max(jnp.abs(out - ref)))

    print("KERNEL_OK")
</pallas_src>

<mosaic_0001>
module attributes {stable_mosaic.version = 11 : i64} {
  func.func @mlp_kernel(%arg0: i32, %arg1: memref<4x128xf32, #tpu.memory_space<vmem>>, %arg2: memref<24x128xf32, #tpu.memory_space<vmem>>, %arg3: memref<3x128xf32, #tpu.memory_space<vmem>>) attributes {dimension_semantics = [#tpu.dimension_semantics<parallel>], iteration_bounds = array<i64: 1>, scalar_prefetch = 0 : i64, scratch_operands = 0 : i64, tpu.core_type = #tpu.core_type<tc>, window_params = [{transform_indices = @transform_0, window_bounds = array<i64: 4, 128>}, {pipeline_mode = #tpu.pipeline_mode<synchronous>, transform_indices = @transform_1, window_bounds = array<i64: 24, 128>}, {transform_indices = @transform_2, window_bounds = array<i64: 3, 128>}]} {
    %c0 = arith.constant 0 : index
    %c0_0 = arith.constant 0 : index
    %0 = vector.load %arg1[%c0, %c0_0] : memref<4x128xf32, #tpu.memory_space<vmem>>, vector<4x128xf32>
    %c0_1 = arith.constant 0 : index
    %c0_2 = arith.constant 0 : index
    %1 = vector.load %arg2[%c0_1, %c0_2] : memref<24x128xf32, #tpu.memory_space<vmem>>, vector<8x5xf32>
    %c8 = arith.constant 8 : index
    %c0_3 = arith.constant 0 : index
    %2 = vector.load %arg2[%c8, %c0_3] : memref<24x128xf32, #tpu.memory_space<vmem>>, vector<6x9xf32>
    %c16 = arith.constant 16 : index
    %c0_4 = arith.constant 0 : index
    %3 = vector.load %arg2[%c16, %c0_4] : memref<24x128xf32, #tpu.memory_space<vmem>>, vector<3x7xf32>
    %4 = vector.extract_strided_slice %1 {offsets = [0, 4], sizes = [8, 1], strides = [1, 1]} : vector<8x5xf32> to vector<8x1xf32>
    %5 = vector.extract_strided_slice %1 {offsets = [0, 0], sizes = [8, 1], strides = [1, 1]} : vector<8x5xf32> to vector<8x1xf32>
    %6 = vector.extract_strided_slice %0 {offsets = [0, 0], sizes = [1, 128], strides = [1, 1]} : vector<4x128xf32> to vector<1x128xf32>
    %7 = vector.broadcast %5 : vector<8x1xf32> to vector<8x128xf32>
    %8 = vector.broadcast %6 : vector<1x128xf32> to vector<8x128xf32>
    %9 = arith.mulf %7, %8 : vector<8x128xf32>
    %10 = vector.broadcast %4 : vector<8x1xf32> to vector<8x128xf32>
    %11 = arith.addf %10, %9 : vector<8x128xf32>
    %12 = vector.extract_strided_slice %1 {offsets = [0, 1], sizes = [8, 1], strides = [1, 1]} : vector<8x5xf32> to vector<8x1xf32>
    %13 = vector.extract_strided_slice %0 {offsets = [1, 0], sizes = [1, 128], strides = [1, 1]} : vector<4x128xf32> to vector<1x128xf32>
    %14 = vector.broadcast %12 : vector<8x1xf32> to vector<8x128xf32>
    %15 = vector.broadcast %13 : vector<1x128xf32> to vector<8x128xf32>
    %16 = arith.mulf %14, %15 : vector<8x128xf32>
    %17 = arith.addf %11, %16 : vector<8x128xf32>
    %18 = vector.extract_strided_slice %1 {offsets = [0, 2], sizes = [8, 1], strides = [1, 1]} : vector<8x5xf32> to vector<8x1xf32>
    %19 = vector.extract_strided_slice %0 {offsets = [2, 0], sizes = [1, 128], strides = [1, 1]} : vector<4x128xf32> to vector<1x128xf32>
    %20 = vector.broadcast %18 : vector<8x1xf32> to vector<8x128xf32>
    %21 = vector.broadcast %19 : vector<1x128xf32> to vector<8x128xf32>
    %22 = arith.mulf %20, %21 : vector<8x128xf32>
    %23 = arith.addf %17, %22 : vector<8x128xf32>
    %24 = vector.extract_strided_slice %1 {offsets = [0, 3], sizes = [8, 1], strides = [1, 1]} : vector<8x5xf32> to vector<8x1xf32>
    %25 = vector.extract_strided_slice %0 {offsets = [3, 0], sizes = [1, 128], strides = [1, 1]} : vector<4x128xf32> to vector<1x128xf32>
    %26 = vector.broadcast %24 : vector<8x1xf32> to vector<8x128xf32>
    %27 = vector.broadcast %25 : vector<1x128xf32> to vector<8x128xf32>
    %28 = arith.mulf %26, %27 : vector<8x128xf32>
    %29 = arith.addf %23, %28 : vector<8x128xf32>
    %cst = arith.constant 0.000000e+00 : f32
    %30 = vector.broadcast %cst : f32 to vector<8x128xf32>
    %31 = arith.maximumf %29, %30 : vector<8x128xf32>
    %32 = vector.extract_strided_slice %2 {offsets = [0, 8], sizes = [6, 1], strides = [1, 1]} : vector<6x9xf32> to vector<6x1xf32>
    %33 = vector.extract_strided_slice %2 {offsets = [0, 0], sizes = [6, 1], strides = [1, 1]} : vector<6x9xf32> to vector<6x1xf32>
    %34 = vector.extract_strided_slice %31 {offsets = [0, 0], sizes = [1, 128], strides = [1, 1]} : vector<8x128xf32> to vector<1x128xf32>
    %35 = vector.broadcast %33 : vector<6x1xf32> to vector<6x128xf32>
    %36 = vector.broadcast %34 : vector<1x128xf32> to vector<6x128xf32>
    %37 = arith.mulf %35, %36 : vector<6x128xf32>
    %38 = vector.broadcast %32 : vector<6x1xf32> to vector<6x128xf32>
    %39 = arith.addf %38, %37 : vector<6x128xf32>
    %40 = vector.extract_strided_slice %2 {offsets = [0, 1], sizes = [6, 1], strides = [1, 1]} : vector<6x9xf32> to vector<6x1xf32>
    %41 = vector.extract_strided_slice %31 {offsets = [1, 0], sizes = [1, 128], strides = [1, 1]} : vector<8x128xf32> to vector<1x128xf32>
    %42 = vector.broadcast %40 : vector<6x1xf32> to vector<6x128xf32>
    %43 = vector.broadcast %41 : vector<1x128xf32> to vector<6x128xf32>
    %44 = arith.mulf %42, %43 : vector<6x128xf32>
    %45 = arith.addf %39, %44 : vector<6x128xf32>
    %46 = vector.extract_strided_slice %2 {offsets = [0, 2], sizes = [6, 1], strides = [1, 1]} : vector<6x9xf32> to vector<6x1xf32>
    %47 = vector.extract_strided_slice %31 {offsets = [2, 0], sizes = [1, 128], strides = [1, 1]} : vector<8x128xf32> to vector<1x128xf32>
    %48 = vector.broadcast %46 : vector<6x1xf32> to vector<6x128xf32>
    %49 = vector.broadcast %47 : vector<1x128xf32> to vector<6x128xf32>
    %50 = arith.mulf %48, %49 : vector<6x128xf32>
    %51 = arith.addf %45, %50 : vector<6x128xf32>
    %52 = vector.extract_strided_slice %2 {offsets = [0, 3], sizes = [6, 1], strides = [1, 1]} : vector<6x9xf32> to vector<6x1xf32>
    %53 = vector.extract_strided_slice %31 {offsets = [3, 0], sizes = [1, 128], strides = [1, 1]} : vector<8x128xf32> to vector<1x128xf32>
    %54 = vector.broadcast %52 : vector<6x1xf32> to vector<6x128xf32>
    %55 = vector.broadcast %53 : vector<1x128xf32> to vector<6x128xf32>
    %56 = arith.mulf %54, %55 : vector<6x128xf32>
    %57 = arith.addf %51, %56 : vector<6x128xf32>
    %58 = vector.extract_strided_slice %2 {offsets = [0, 4], sizes = [6, 1], strides = [1, 1]} : vector<6x9xf32> to vector<6x1xf32>
    %59 = vector.extract_strided_slice %31 {offsets = [4, 0], sizes = [1, 128], strides = [1, 1]} : vector<8x128xf32> to vector<1x128xf32>
    %60 = vector.broadcast %58 : vector<6x1xf32> to vector<6x128xf32>
    %61 = vector.broadcast %59 : vector<1x128xf32> to vector<6x128xf32>
    %62 = arith.mulf %60, %61 : vector<6x128xf32>
    %63 = arith.addf %57, %62 : vector<6x128xf32>
    %64 = vector.extract_strided_slice %2 {offsets = [0, 5], sizes = [6, 1], strides = [1, 1]} : vector<6x9xf32> to vector<6x1xf32>
    %65 = vector.extract_strided_slice %31 {offsets = [5, 0], sizes = [1, 128], strides = [1, 1]} : vector<8x128xf32> to vector<1x128xf32>
    %66 = vector.broadcast %64 : vector<6x1xf32> to vector<6x128xf32>
    %67 = vector.broadcast %65 : vector<1x128xf32> to vector<6x128xf32>
    %68 = arith.mulf %66, %67 : vector<6x128xf32>
    %69 = arith.addf %63, %68 : vector<6x128xf32>
    %70 = vector.extract_strided_slice %2 {offsets = [0, 6], sizes = [6, 1], strides = [1, 1]} : vector<6x9xf32> to vector<6x1xf32>
    %71 = vector.extract_strided_slice %31 {offsets = [6, 0], sizes = [1, 128], strides = [1, 1]} : vector<8x128xf32> to vector<1x128xf32>
    %72 = vector.broadcast %70 : vector<6x1xf32> to vector<6x128xf32>
    %73 = vector.broadcast %71 : vector<1x128xf32> to vector<6x128xf32>
    %74 = arith.mulf %72, %73 : vector<6x128xf32>
    %75 = arith.addf %69, %74 : vector<6x128xf32>
    %76 = vector.extract_strided_slice %2 {offsets = [0, 7], sizes = [6, 1], strides = [1, 1]} : vector<6x9xf32> to vector<6x1xf32>
    %77 = vector.extract_strided_slice %31 {offsets = [7, 0], sizes = [1, 128], strides = [1, 1]} : vector<8x128xf32> to vector<1x128xf32>
    %78 = vector.broadcast %76 : vector<6x1xf32> to vector<6x128xf32>
    %79 = vector.broadcast %77 : vector<1x128xf32> to vector<6x128xf32>
    %80 = arith.mulf %78, %79 : vector<6x128xf32>
    %81 = arith.addf %75, %80 : vector<6x128xf32>
    %cst_5 = arith.constant 0.000000e+00 : f32
    %82 = vector.broadcast %cst_5 : f32 to vector<6x128xf32>
    %83 = arith.maximumf %81, %82 : vector<6x128xf32>
    %84 = vector.extract_strided_slice %3 {offsets = [0, 6], sizes = [3, 1], strides = [1, 1]} : vector<3x7xf32> to vector<3x1xf32>
    %85 = vector.extract_strided_slice %3 {offsets = [0, 0], sizes = [3, 1], strides = [1, 1]} : vector<3x7xf32> to vector<3x1xf32>
    %86 = vector.extract_strided_slice %83 {offsets = [0, 0], sizes = [1, 128], strides = [1, 1]} : vector<6x128xf32> to vector<1x128xf32>
    %87 = vector.broadcast %85 : vector<3x1xf32> to vector<3x128xf32>
    %88 = vector.broadcast %86 : vector<1x128xf32> to vector<3x128xf32>
    %89 = arith.mulf %87, %88 : vector<3x128xf32>
    %90 = vector.broadcast %84 : vector<3x1xf32> to vector<3x128xf32>
    %91 = arith.addf %90, %89 : vector<3x128xf32>
    %92 = vector.extract_strided_slice %3 {offsets = [0, 1], sizes = [3, 1], strides = [1, 1]} : vector<3x7xf32> to vector<3x1xf32>
    %93 = vector.extract_strided_slice %83 {offsets = [1, 0], sizes = [1, 128], strides = [1, 1]} : vector<6x128xf32> to vector<1x128xf32>
    %94 = vector.broadcast %92 : vector<3x1xf32> to vector<3x128xf32>
    %95 = vector.broadcast %93 : vector<1x128xf32> to vector<3x128xf32>
    %96 = arith.mulf %94, %95 : vector<3x128xf32>
    %97 = arith.addf %91, %96 : vector<3x128xf32>
    %98 = vector.extract_strided_slice %3 {offsets = [0, 2], sizes = [3, 1], strides = [1, 1]} : vector<3x7xf32> to vector<3x1xf32>
    %99 = vector.extract_strided_slice %83 {offsets = [2, 0], sizes = [1, 128], strides = [1, 1]} : vector<6x128xf32> to vector<1x128xf32>
    %100 = vector.broadcast %98 : vector<3x1xf32> to vector<3x128xf32>
    %101 = vector.broadcast %99 : vector<1x128xf32> to vector<3x128xf32>
    %102 = arith.mulf %100, %101 : vector<3x128xf32>
    %103 = arith.addf %97, %102 : vector<3x128xf32>
    %104 = vector.extract_strided_slice %3 {offsets = [0, 3], sizes = [3, 1], strides = [1, 1]} : vector<3x7xf32> to vector<3x1xf32>
    %105 = vector.extract_strided_slice %83 {offsets = [3, 0], sizes = [1, 128], strides = [1, 1]} : vector<6x128xf32> to vector<1x128xf32>
    %106 = vector.broadcast %104 : vector<3x1xf32> to vector<3x128xf32>
    %107 = vector.broadcast %105 : vector<1x128xf32> to vector<3x128xf32>
    %108 = arith.mulf %106, %107 : vector<3x128xf32>
    %109 = arith.addf %103, %108 : vector<3x128xf32>
    %110 = vector.extract_strided_slice %3 {offsets = [0, 4], sizes = [3, 1], strides = [1, 1]} : vector<3x7xf32> to vector<3x1xf32>
    %111 = vector.extract_strided_slice %83 {offsets = [4, 0], sizes = [1, 128], strides = [1, 1]} : vector<6x128xf32> to vector<1x128xf32>
    %112 = vector.broadcast %110 : vector<3x1xf32> to vector<3x128xf32>
    %113 = vector.broadcast %111 : vector<1x128xf32> to vector<3x128xf32>
    %114 = arith.mulf %112, %113 : vector<3x128xf32>
    %115 = arith.addf %109, %114 : vector<3x128xf32>
    %116 = vector.extract_strided_slice %3 {offsets = [0, 5], sizes = [3, 1], strides = [1, 1]} : vector<3x7xf32> to vector<3x1xf32>
    %117 = vector.extract_strided_slice %83 {offsets = [5, 0], sizes = [1, 128], strides = [1, 1]} : vector<6x128xf32> to vector<1x128xf32>
    %118 = vector.broadcast %116 : vector<3x1xf32> to vector<3x128xf32>
    %119 = vector.broadcast %117 : vector<1x128xf32> to vector<3x128xf32>
    %120 = arith.mulf %118, %119 : vector<3x128xf32>
    %121 = arith.addf %115, %120 : vector<3x128xf32>
    %c0_6 = arith.constant 0 : index
    %c0_7 = arith.constant 0 : index
    %122 = vector.load %arg3[%c0_6, %c0_7] : memref<3x128xf32, #tpu.memory_space<vmem>>, vector<3x128xf32>
    tpu.vector_store %arg3[%c0_6, %c0_7], %121 {strides = array<i32>} : memref<3x128xf32, #tpu.memory_space<vmem>>, vector<3x128xf32>,
    return
  }
  func.func @transform_0(%arg0: i32) -> (i32, i32) {
    %c0_i32 = arith.constant 0 : i32
    %c0_i32_0 = arith.constant 0 : i32
    return %c0_i32, %arg0 : i32, i32
  }
  func.func @transform_1(%arg0: i32) -> (i32, i32) {
    %c0_i32 = arith.constant 0 : i32
    %c0_i32_0 = arith.constant 0 : i32
    %c0_i32_1 = arith.constant 0 : i32
    return %c0_i32, %c0_i32_0 : i32, i32
  }
  func.func @transform_2(%arg0: i32) -> (i32, i32) {
    %c0_i32 = arith.constant 0 : i32
    %c0_i32_0 = arith.constant 0 : i32
    return %c0_i32, %arg0 : i32, i32
  }
}

</mosaic_0001>

<bundles_post_ra>
// kernel: tpu_custom_call.1
= control target key start
LH: loop header
LB: loop body
LE: loop exit
PB: predicated region body
PF: predicated region fallthrough
CT: control target
= control target key end

     0   :  { %7 = vsyncpa [#allocation3], 0  ;;  %s465_s0 = inlined_call_operand.hbm [shape: f32[4,128], index: 0, kind: input, shape index: {}]   ;;  %s466_s1 = inlined_call_operand.hbm [shape: f32[24,128], index: 1, kind: input, shape index: {}]   ;;  %s467_s2 = inlined_call_operand.hbm [shape: f32[3,128], index: 2, kind: output, shape index: {}]  }
   0x1   :  { %8 = vsyncpa [#allocation6], 0 }
   0x2   :  { %9 = vsyncpa [#allocation4], 0  ;;  %s363_s9 = smov [#allocation2]   ;;  %s364_s11 = smov [#allocation5]  }
   0x3   :  { %s16_s10 = sshll.u32 %s363_s9, 4  ;;  %s25_s12 = sshll.u32 %s364_s11, 4  ;;  %s17_s10 = int_to_ptr.vmem [resolvable:$true] %s16_s10  ;;  %s392_s12 = int_to_ptr.vmem [resolvable:$true] %s25_s12 }
   0x4   :  { %s291_s15 = scalar_lea.hbm %s465_s0, 64 }
   0x5   :  { %p292_p0 = scmp.ne.s32.totalorder %s465_s0, %s291_s15  ;;  %p295_p1 = scmp.lt.u32.totalorder %s291_s15, %s465_s0 }
   0x7   :  { %p297_p2 = pnand %p295_p1, %p292_p0 }
   0x9   :  { %300 = shalt.err (!%p297_p2)
}
   0xa   :  { %s301_s20 = scalar_lea.vmem %s17_s10, 64  ;;  %p306_p4 = scmp.lt.s32.totalorder %s17_s10, %s17_s10 }
   0xb   :  { %p302_p3 = scmp.ne.s32.totalorder %s17_s10, %s301_s20  ;;  %p307_p5 = scmp.lt.s32.totalorder %s301_s20, %s301_s20 }
   0xd   :  { %p308_p6 = por %p307_p5, %p306_p4 }
   0xf   :  { %p309_p7 = pnand %p308_p6, %p302_p3 }
  0x11   :  { %312 = shalt.err (!%p309_p7)
}
  0x12   :  { %19 = dma.hbm_to_vmem [thread:$0]  %s465_s0, 64, %s17_s10, [#allocation3]  }
  0x13   :  { %s313_s25 = scalar_lea.hbm %s466_s1, 384 }
  0x14   :  { %p314_p8 = scmp.ne.s32.totalorder %s466_s1, %s313_s25  ;;  %p317_p9 = scmp.lt.u32.totalorder %s313_s25, %s466_s1 }
  0x16   :  { %p319_p10 = pnand %p317_p9, %p314_p8 }
  0x18   :  { %322 = shalt.err (!%p319_p10)
}
  0x19   :  { %s323_s30 = scalar_lea.vmem %s392_s12, 384  ;;  %p328_p12 = scmp.lt.s32.totalorder %s392_s12, %s392_s12 }
  0x1a   :  { %p324_p11 = scmp.ne.s32.totalorder %s392_s12, %s323_s30  ;;  %p329_p13 = scmp.lt.s32.totalorder %s323_s30, %s323_s30 }
  0x1c   :  { %p330_p0 = por %p329_p13, %p328_p12 }
  0x1e   :  { %p331_p1 = pnand %p330_p0, %p324_p11 }
  0x20   :  { %334 = shalt.err (!%p331_p1)
}
  0x21   :  { %s365_s0 = smov 128   ;;  %s366_s3 = smov 8  }
  0x22   :  { %31 = dma.hbm_to_vmem [thread:$0]  %s466_s1, 384, %s392_s12, [#allocation6], %s365_s0, %s365_s0, %s366_s3  }
  0x23   :  { %357 = dma.done.wait [#allocation3], 64  }
  0x24   :  { %358 = vsyncadd [#allocation3], 4294967232 }
  0x25   :  { %359 = dma.done.wait [#allocation6], 384  }
  0x26   :  { %360 = vsyncadd [#allocation6], 4294966912  ;;  %v367_v0 = vmov 1   ;;  %v368_v1 = vmov 0   ;;  %v39_v2 = vld [vmem:[#allocation5] sm:$0xff]  ;;  %v369_v3 = vmov 2   ;;  %v47_v12 = vlaneseq }
  0x27   :  { %272 = vset.pattern.permute.xlu1 %v367_v0  ;;  %270 = vset.pattern.permute.xlu0 %v368_v1  ;;  %v370_v4 = vmov 4   ;;  %v40_v5 = vld [vmem:[#allocation5 + $0x8] sm:$0x3f]  ;;  %v371_v6 = vmov 3   ;;  %v372_v7 = vmov 8   ;;  %v373_v8 = vmov 5  }
  0x28   :  { %58 = vperm.xlu1 %272, %v39_v2   ;;  %44 = vperm.xlu0 %270, %v39_v2   ;;  %v41_v9 = vld [vmem:[#allocation5 + $0x10] sm:$0x7]  ;;  %v374_v10 = vmov 6   ;;  %v375_v11 = vmov 7   ;;  %v423_v13 = vshrl.u32 %v47_v12, 7  ;;  %s376_s1 = smov [#allocation7]  }
  0x29   :  { %v38_v15 = vld [vmem:[#allocation2] sm:$0xf]  ;;  %s246_s6 = sshll.u32 %s376_s1, 4  ;;  %s247_s6 = int_to_ptr.vmem [resolvable:$true] %s246_s6 }
  0x2a   :  { %v426_v14 = vsub.s32 0, %v423_v13  ;;  %v429_v16 = vsub.s32 1, %v423_v13  ;;  %v433_v20 = vsub.s32 2, %v423_v13  ;;  %v437_v23 = vsub.s32 3, %v423_v13  ;;  %s335_s7 = scalar_lea.vmem %s247_s6, 64  ;;  %p340_p3 = scmp.lt.s32.totalorder %s247_s6, %s247_s6 }
  0x2b   :  { %v139_v51 = vsub.s32 4, %v423_v13  ;;  %v149_v54 = vsub.s32 5, %v423_v13  ;;  %v159_v59 = vsub.s32 6, %v423_v13  ;;  %p336_p2 = scmp.ne.s32.totalorder %s247_s6, %s335_s7  ;;  %p341_p4 = scmp.lt.s32.totalorder %s335_s7, %s335_s7 }
  0x2c   :  { %273 = vset.pattern.permute.xlu1 %v369_v3  ;;  %271 = vset.pattern.permute.xlu0 %v370_v4  ;;  %v50_v17 = vrot.slane %v38_v15, %v426_v14  ;;  %v64_v21 = vrot.slane %v38_v15, %v429_v16  ;;  %v74_v24 = vrot.slane %v38_v15, %v433_v20 }
  0x2d   :  { %68 = vperm.xlu1 %273, %v39_v2   ;;  %53 = vperm.xlu0 %271, %v39_v2   ;;  %v84_v29 = vrot.slane %v38_v15, %v437_v23  ;;  %p342_p5 = por %p341_p4, %p340_p3 }
  0x2f   :  { %p343_p6 = pnand %p342_p5, %p336_p2 }
  0x31   :  { %274 = vset.pattern.permute.xlu1 %v371_v6  ;;  %275 = vset.pattern.permute.xlu0 %v368_v1 }
  0x32   :  { %78 = vperm.xlu1 %274, %v39_v2   ;;  %90 = vperm.xlu0 %275, %v40_v5   ;;  %v169_v2 = vsub.s32 7, %v423_v13 }
  0x36   :  { %276 = vset.pattern.permute.xlu1 %v372_v7  ;;  %278 = vset.pattern.permute.xlu0 %v369_v3 }
  0x37   :  { %99 = vperm.xlu1 %276, %v40_v5   ;;  %114 = vperm.xlu0 %278, %v40_v5  }
  0x3b   :  { %277 = vset.pattern.permute.xlu1 %v367_v0  ;;  %281 = vset.pattern.permute.xlu0 %v373_v8 }
  0x3c   :  { %104 = vperm.xlu1 %277, %v40_v5   ;;  %144 = vperm.xlu0 %281, %v40_v5  }
  0x40   :  { %279 = vset.pattern.permute.xlu1 %v371_v6  ;;  %284 = vset.pattern.permute.xlu0 %v368_v1 }
  0x41   :  { %124 = vperm.xlu1 %279, %v40_v5   ;;  %176 = vperm.xlu0 %284, %v41_v9  }
  0x45   :  { %280 = vset.pattern.permute.xlu1 %v370_v4  ;;  %287 = vset.pattern.permute.xlu0 %v369_v3 }
  0x46   :  { %134 = vperm.xlu1 %280, %v40_v5   ;;  %200 = vperm.xlu0 %287, %v41_v9  }
  0x4a   :  { %282 = vset.pattern.permute.xlu1 %v374_v10  ;;  %290 = vset.pattern.permute.xlu0 %v373_v8 }
  0x4b   :  { %154 = vperm.xlu1 %282, %v40_v5   ;;  %230 = vperm.xlu0 %290, %v41_v9  }
  0x4f   :  { %283 = vset.pattern.permute.xlu1 %v375_v11 }
  0x50   :  { %164 = vperm.xlu1 %283, %v40_v5  }
  0x54   :  { %285 = vset.pattern.permute.xlu1 %v374_v10 }
  0x55   :  { %185 = vperm.xlu1 %285, %v41_v9  }
  0x59   :  { %286 = vset.pattern.permute.xlu1 %v367_v0 }
  0x5a   :  { %190 = vperm.xlu1 %286, %v41_v9  }
  0x5e   :  { %288 = vset.pattern.permute.xlu1 %v371_v6 }
  0x5f   :  { %210 = vperm.xlu1 %288, %v41_v9  }
  0x63   :  { %289 = vset.pattern.permute.xlu1 %v370_v4 }
  0x64   :  { %220 = vperm.xlu1 %289, %v41_v9  }
  0xa7   :  { %v59_v18 = vpop.permute.xlu1 %58  ;;  %v45_v19 = vpop.permute.xlu0 %44 }
  0xa8   :  { %v51_v22 = vmul.f32 %v50_v17, %v45_v19  ;;  %v65_v27 = vmul.f32 %v64_v21, %v59_v18 }
  0xac   :  { %v69_v25 = vpop.permute.xlu1 %68  ;;  %v54_v26 = vpop.permute.xlu0 %53 }
  0xad   :  { %v56_v28 = vadd.f32 %v54_v26, %v51_v22  ;;  %v75_v30 = vmul.f32 %v74_v24, %v69_v25 }
  0xaf   :  { %v66_v31 = vadd.f32 %v65_v27, %v56_v28 }
  0xb1   :  { %v79_v32 = vpop.permute.xlu1 %78  ;;  %v76_v33 = vadd.f32 %v75_v30, %v66_v31  ;;  %v91_v39 = vpop.permute.xlu0 %90 }
  0xb2   :  { %v85_v34 = vmul.f32 %v84_v29, %v79_v32 }
  0xb4   :  { %v86_v35 = vadd.f32 %v85_v34, %v76_v33 }
  0xb6   :  { %v87_v36 = vmax.f32 %v86_v35, 0.0  ;;  %v100_v37 = vpop.permute.xlu1 %99  ;;  %v115_v47 = vpop.permute.xlu0 %114 }
  0xb8   :  { %v96_v38 = vrot.slane %v87_v36, %v426_v14  ;;  %v110_v41 = vrot.slane %v87_v36, %v429_v16  ;;  %v120_v44 = vrot.slane %v87_v36, %v433_v20  ;;  %v130_v50 = vrot.slane %v87_v36, %v437_v23 }
  0xb9   :  { %v140_v55 = vrot.slane %v87_v36, %v139_v51  ;;  %v150_v61 = vrot.slane %v87_v36, %v149_v54  ;;  %v160_v1 = vrot.slane %v87_v36, %v159_v59  ;;  %v170_v5 = vrot.slane %v87_v36, %v169_v2 }
  0xba   :  { %v97_v40 = vmul.f32 %v96_v38, %v91_v39  ;;  %v121_v48 = vmul.f32 %v120_v44, %v115_v47 }
  0xbb   :  { %v105_v42 = vpop.permute.xlu1 %104  ;;  %v145_v60 = vpop.permute.xlu0 %144 }
  0xbc   :  { %v102_v43 = vadd.f32 %v100_v37, %v97_v40  ;;  %v111_v45 = vmul.f32 %v110_v41, %v105_v42  ;;  %v151_v63 = vmul.f32 %v150_v61, %v145_v60 }
  0xbe   :  { %v112_v46 = vadd.f32 %v111_v45, %v102_v43 }
  0xc0   :  { %v125_v49 = vpop.permute.xlu1 %124  ;;  %v122_v52 = vadd.f32 %v121_v48, %v112_v46  ;;  %v177_v15 = vpop.permute.xlu0 %176 }
  0xc1   :  { %v131_v53 = vmul.f32 %v130_v50, %v125_v49 }
  0xc3   :  { %v132_v57 = vadd.f32 %v131_v53, %v122_v52 }
  0xc5   :  { %v135_v56 = vpop.permute.xlu1 %134  ;;  %v201_v25 = vpop.permute.xlu0 %200 }
  0xc6   :  { %v141_v58 = vmul.f32 %v140_v55, %v135_v56 }
  0xc8   :  { %v142_v62 = vadd.f32 %v141_v58, %v132_v57 }
  0xca   :  { %v155_v0 = vpop.permute.xlu1 %154  ;;  %v152_v3 = vadd.f32 %v151_v63, %v142_v62 }
  0xcb   :  { %v161_v4 = vmul.f32 %v160_v1, %v155_v0 }
  0xcd   :  { %v162_v7 = vadd.f32 %v161_v4, %v152_v3 }
  0xcf   :  { %v165_v6 = vpop.permute.xlu1 %164 }
  0xd0   :  { %v171_v8 = vmul.f32 %v170_v5, %v165_v6 }
  0xd2   :  { %v172_v9 = vadd.f32 %v171_v8, %v162_v7 }
  0xd4   :  { %v173_v10 = vmax.f32 %v172_v9, 0.0  ;;  %v186_v11 = vpop.permute.xlu1 %185 }
  0xd6   :  { %v182_v12 = vrot.slane %v173_v10, %v426_v14  ;;  %v196_v18 = vrot.slane %v173_v10, %v429_v16  ;;  %v206_v21 = vrot.slane %v173_v10, %v433_v20  ;;  %v216_v28 = vrot.slane %v173_v10, %v437_v23  ;;  %v231_v14 = vpop.permute.xlu0 %230 }
  0xd7   :  { %v236_v31 = vrot.slane %v173_v10, %v149_v54  ;;  %v226_v32 = vrot.slane %v173_v10, %v139_v51 }
  0xd8   :  { %v183_v17 = vmul.f32 %v182_v12, %v177_v15  ;;  %v207_v26 = vmul.f32 %v206_v21, %v201_v25 }
  0xd9   :  { %v191_v19 = vpop.permute.xlu1 %190  ;;  %v237_v16 = vmul.f32 %v236_v31, %v231_v14 }
  0xda   :  { %v188_v22 = vadd.f32 %v186_v11, %v183_v17  ;;  %v197_v13 = vmul.f32 %v196_v18, %v191_v19 }
  0xdc   :  { %v198_v24 = vadd.f32 %v197_v13, %v188_v22 }
  0xde   :  { %v211_v27 = vpop.permute.xlu1 %210  ;;  %v208_v29 = vadd.f32 %v207_v26, %v198_v24 }
  0xdf   :  { %v217_v30 = vmul.f32 %v216_v28, %v211_v27 }
  0xe1   :  { %v218_v34 = vadd.f32 %v217_v30, %v208_v29 }
  0xe3   :  { %v221_v33 = vpop.permute.xlu1 %220 }
  0xe4   :  { %v227_v35 = vmul.f32 %v226_v32, %v221_v33 }
  0xe6   :  { %v228_v20 = vadd.f32 %v227_v35, %v218_v34 }
  0xe8   :  { %v238_v36 = vadd.f32 %v237_v16, %v228_v20 }
  0xea   :  { %239 = vst [vmem:[#allocation7] sm:$0x7] %v238_v36 }
  0xeb   :  { %346 = shalt.err (!%p343_p6)
}
  0xec   :  { %s347_s10 = scalar_lea.hbm %s467_s2, 64 }
  0xed   :  { %p348_p7 = scmp.ne.s32.totalorder %s467_s2, %s347_s10  ;;  %p351_p8 = scmp.lt.u32.totalorder %s347_s10, %s467_s2 }
  0xef   :  { %p353_p9 = pnand %p351_p8, %p348_p7 }
  0xf1   :  { %356 = shalt.err (!%p353_p9)
}
  0xf2   :  { %249 = dma.vmem_to_hbm [thread:$0]  %s247_s6, 64, %s467_s2, [#allocation4]  }
  0xf3   :  { %361 = dma.done.wait [#allocation4], 64  }
  0xf4   :  { %362 = vsyncadd [#allocation4], 4294967232 }
  0xf5   :  { %253 = vsyncpa [#allocation3], 1 }
  0xf6   :  { %254 = vsyncpa [#allocation6], 1 }
  0xf7   :  { %255 = vsyncpa [#allocation4], 1 }

</bundles_post_ra>
